<compile_context>
chip_gen: v7x
topology: tpu7x:2x2x1
jax: 0.10.0
libtpu: 0.0.40
codegen_flags: <defaults>
</compile_context>

<pallas_src>
import functools

import jax
import jax.numpy as jnp
from jax import lax
from jax.experimental import pallas as pl
from jax.experimental.pallas import tpu as pltpu


def _spatial_gather_kernel(probs_ref, feats_ref, out_ref, smax_ref, acc_ref, *,
                           scale):
    # probs_ref: (K, HW)   -- full spatial extent, resident per batch
    # feats_ref: (Tc, T)   -- streamed feats tile (C-chunk x HW-chunk)
    # out_ref  : (K, Tc)   -- resident across the HW (t) axis
    # smax_ref : (K, HW) f32 scratch -- softmax weights
    # acc_ref  : (K, Tc) f32 scratch -- matmul accumulator
    t = pl.program_id(2)

    @pl.when(t == 0)
    def _init():
        p = probs_ref[...].astype(jnp.float32) * scale
        m = jnp.max(p, axis=-1, keepdims=True)
        e = jnp.exp(p - m)
        inv = pl.reciprocal(jnp.sum(e, axis=-1, keepdims=True), approx=True)
        smax_ref[...] = e * inv
        acc_ref[...] = jnp.zeros_like(acc_ref)

    T = feats_ref.shape[1]
    start = t * T
    if T % 128 == 0:
        start = pl.multiple_of(start, 128)
    # (K, T) chunk of the softmax weights; cast once to the feats dtype so the
    # MXU runs its native (e.g. bf16) path with f32 accumulation.
    s_chunk = smax_ref[:, pl.ds(start, T)].astype(feats_ref.dtype)
    # Contract over the last axis of BOTH operands: (K, T) x (Tc, T) -> (K, Tc)
    acc_ref[...] += lax.dot_general(
        s_chunk, feats_ref[...],
        dimension_numbers=(((1,), (1,)), ((), ())),
        preferred_element_type=jnp.float32)

    @pl.when(t == pl.num_programs(2) - 1)
    def _finalize():
        out_ref[...] = acc_ref[...].astype(out_ref.dtype)


def _pick_tile(total, max_tile, unit):
    """Largest multiple of `unit` that divides `total` and is <= max_tile.

    Falls back to the full extent (always a legal block size) if no such
    divisor exists.
    """
    best = None
    cand = unit
    limit = min(total, max_tile)
    while cand <= limit:
        if total % cand == 0:
            best = cand
        cand += unit
    return best if best is not None else total


def spatial_gather(feats, probs, scale=1.0, *, max_hw_tile=2048, max_c_tile=512):
    """feats: (B, C, H, W), probs: (B, K, H, W) -> (B, C, K, 1)."""
    B, C, H, W = feats.shape
    Bk, K, Hp, Wp = probs.shape
    assert B == Bk and H == Hp and W == Wp
    HW = H * W

    # Pure views: no HBM data movement in the wrapper.
    probs_flat = probs.reshape(B, K, HW)   # (B, K, HW)
    feats_flat = feats.reshape(B, C, HW)   # (B, C, HW)  -- natural layout

    T = _pick_tile(HW, max_hw_tile, 128)   # HW (reduction) tile, lane-aligned
    Tc = _pick_tile(C, max_c_tile, 128)    # C tile, lane-aligned for the output
    n_t = HW // T
    n_c = C // Tc

    itemsize = jnp.dtype(feats.dtype).itemsize
    cost = pl.CostEstimate(
        flops=2 * B * K * HW * C,
        transcendentals=B * K * HW,
        bytes_accessed=int(B * C * HW * itemsize
                           + B * K * HW * jnp.dtype(probs.dtype).itemsize
                           + B * K * C * itemsize),
    )

    out = pl.pallas_call(
        functools.partial(_spatial_gather_kernel, scale=float(scale)),
        out_shape=jax.ShapeDtypeStruct((B, K, C), feats.dtype),
        grid_spec=pltpu.PrefetchScalarGridSpec(
            num_scalar_prefetch=0,
            grid=(B, n_c, n_t),
            in_specs=[
                # probs: full (K, HW) slab, resident across (c, t).
                pl.BlockSpec((None, K, HW), lambda b, c, t: (b, 0, 0)),
                # feats: (Tc, T) tile streamed over C and HW, natural layout.
                pl.BlockSpec((None, Tc, T), lambda b, c, t: (b, c, t)),
            ],
            # out: (K, Tc), resident across the reduction axis t.
            out_specs=pl.BlockSpec((None, K, Tc), lambda b, c, t: (b, 0, c)),
            scratch_shapes=[
                pltpu.VMEM((K, HW), jnp.float32),   # softmax weights
                pltpu.VMEM((K, Tc), jnp.float32),   # f32 accumulator
            ],
        ),
        compiler_params=pltpu.CompilerParams(
            dimension_semantics=("parallel", "parallel", "arbitrary"),
            vmem_limit_bytes=48 * 1024 * 1024,
        ),
        cost_estimate=cost,
    )(probs_flat, feats_flat)                                   # (B, K, C)

    # permute(0, 2, 1).unsqueeze(3) on the tiny (K*C) result -> (B, C, K, 1)
    return jnp.transpose(out, (0, 2, 1))[..., None]


def _reference(feats, probs, scale=1.0):
    B, C, H, W = feats.shape
    K = probs.shape[1]
    p = probs.reshape(B, K, H * W)
    f = jnp.transpose(feats.reshape(B, C, H * W), (0, 2, 1))
    p = jax.nn.softmax(scale * p, axis=2)
    ctx = jnp.einsum("bkh,bhc->bkc", p, f)
    return jnp.transpose(ctx, (0, 2, 1))[..., None]


if __name__ == "__main__":
    key = jax.random.PRNGKey(0)
    kf, kp = jax.random.split(key)

    B, C, K, H, W = 2, 32, 8, 16, 16  # small synthetic shapes
    feats = jax.random.normal(kf, (B, C, H, W), dtype=jnp.float32)
    probs = jax.random.normal(kp, (B, K, H, W), dtype=jnp.float32)

    out = spatial_gather(feats, probs, scale=1.0)
    out = jax.block_until_ready(out)

    ref = _reference(feats, probs, scale=1.0)
    assert out.shape == (B, C, K, 1), out.shape
    # Tolerance loosened slightly for the EUP approximate reciprocal in the
    # softmax denominator and the tiled (reassociated) f32 accumulation.
    assert jnp.allclose(out, ref, atol=2e-3, rtol=2e-3), "mismatch vs reference"

    print("KERNEL_OK")
</pallas_src>

<mosaic_0001>
module attributes {stable_mosaic.version = 11 : i64} {
  func.func @_spatial_gather_kernel(%arg0: i32, %arg1: i32, %arg2: i32, %arg3: memref<1x8x256xf32, #tpu.memory_space<vmem>>, %arg4: memref<1x32x256xf32, #tpu.memory_space<vmem>>, %arg5: memref<1x8x32xf32, #tpu.memory_space<vmem>>, %arg6: memref<8x256xf32, #tpu.memory_space<vmem>>, %arg7: memref<8x32xf32, #tpu.memory_space<vmem>>) attributes {dimension_semantics = [#tpu.dimension_semantics<parallel>, #tpu.dimension_semantics<parallel>, #tpu.dimension_semantics<arbitrary>], iteration_bounds = array<i64: 2, 1, 1>, scalar_prefetch = 0 : i64, scratch_operands = 2 : i64, tpu.core_type = #tpu.core_type<tc>, window_params = [{transform_indices = @transform_0, window_bounds = array<i64: 1, 8, 256>}, {transform_indices = @transform_1, window_bounds = array<i64: 1, 32, 256>}, {transform_indices = @transform_2, window_bounds = array<i64: 1, 8, 32>}]} {
    %c0_i32 = arith.constant 0 : i32
    %0 = arith.cmpi eq, %arg2, %c0_i32 : i32
    %1 = arith.extui %0 : i1 to i32
    %c0_i32_0 = arith.constant 0 : i32
    %2 = arith.cmpi ne, %1, %c0_i32_0 : i32
    scf.if %2 {
      %c0_10 = arith.constant 0 : index
      %c0_11 = arith.constant 0 : index
      %c0_12 = arith.constant 0 : index
      %16 = vector.load %arg3[%c0_10, %c0_11, %c0_12] : memref<1x8x256xf32, #tpu.memory_space<vmem>>, vector<1x8x256xf32>
      %17 = vector.shape_cast %16 : vector<1x8x256xf32> to vector<8x256xf32>
      %cst_13 = arith.constant 1.000000e+00 : f32
      %18 = vector.broadcast %cst_13 : f32 to vector<8x256xf32>
      %19 = arith.mulf %17, %18 : vector<8x256xf32>
      %cst_14 = arith.constant dense<0xFF800000> : vector<8xf32>
      %20 = vector.multi_reduction <maximumf>, %19, %cst_14 [1] : vector<8x256xf32> to vector<8xf32>
      %21 = vector.shape_cast %20 : vector<8xf32> to vector<8x1xf32>
      %22 = vector.broadcast %21 : vector<8x1xf32> to vector<8x256xf32>
      %23 = arith.subf %19, %22 : vector<8x256xf32>
      %24 = math.exp %23 : vector<8x256xf32>
      %cst_15 = arith.constant dense<0.000000e+00> : vector<8xf32>
      %25 = vector.multi_reduction <add>, %24, %cst_15 [1] : vector<8x256xf32> to vector<8xf32>
      %26 = vector.shape_cast %25 : vector<8xf32> to vector<8x1xf32>
      %27 = tpu.reciprocal %26 {approx = true} : vector<8x1xf32> -> vector<8x1xf32>
      %28 = vector.broadcast %27 : vector<8x1xf32> to vector<8x256xf32>
      %29 = arith.mulf %24, %28 : vector<8x256xf32>
      %c0_16 = arith.constant 0 : index
      %c0_17 = arith.constant 0 : index
      %30 = vector.load %arg6[%c0_16, %c0_17] : memref<8x256xf32, #tpu.memory_space<vmem>>, vector<8x256xf32>
      tpu.vector_store %arg6[%c0_16, %c0_17], %29 {strides = array<i32>} : memref<8x256xf32, #tpu.memory_space<vmem>>, vector<8x256xf32>,
      %cst_18 = arith.constant 0.000000e+00 : f32
      %31 = vector.broadcast %cst_18 : f32 to vector<8x32xf32>
      %c0_19 = arith.constant 0 : index
      %c0_20 = arith.constant 0 : index
      %32 = vector.load %arg7[%c0_19, %c0_20] : memref<8x32xf32, #tpu.memory_space<vmem>>, vector<8x32xf32>
      tpu.vector_store %arg7[%c0_19, %c0_20], %31 {strides = array<i32>} : memref<8x32xf32, #tpu.memory_space<vmem>>, vector<8x32xf32>,
    } else {
    }
    %c256_i32 = arith.constant 256 : i32
    %3 = arith.muli %arg2, %c256_i32 : i32
    %4 = tpu.assume_multiple %3, 128 : i32
    %c0 = arith.constant 0 : index
    %5 = arith.index_cast %4 : i32 to index
    %6 = vector.load %arg6[%c0, %5] : memref<8x256xf32, #tpu.memory_space<vmem>>, vector<8x256xf32>
    %c0_1 = arith.constant 0 : index
    %c0_2 = arith.constant 0 : index
    %7 = vector.load %arg7[%c0_1, %c0_2] : memref<8x32xf32, #tpu.memory_space<vmem>>, vector<8x32xf32>
    %c0_3 = arith.constant 0 : index
    %c0_4 = arith.constant 0 : index
    %c0_5 = arith.constant 0 : index
    %8 = vector.load %arg4[%c0_3, %c0_4, %c0_5] : memref<1x32x256xf32, #tpu.memory_space<vmem>>, vector<1x32x256xf32>
    %9 = vector.shape_cast %8 : vector<1x32x256xf32> to vector<32x256xf32>
    %cst = arith.constant dense<0.000000e+00> : vector<8x32xf32>
    %10 = tpu.matmul %6, %9, %cst {dimension_numbers = #tpu.dot_dimension_numbers<[1], [1], [0], [0], [0, 0, 1, 0], [], []>} : vector<8x256xf32>, vector<32x256xf32>, vector<8x32xf32> -> vector<8x32xf32>
    %11 = arith.addf %7, %10 : vector<8x32xf32>
    %c0_6 = arith.constant 0 : index
    %c0_7 = arith.constant 0 : index
    %12 = vector.load %arg7[%c0_6, %c0_7] : memref<8x32xf32, #tpu.memory_space<vmem>>, vector<8x32xf32>
    tpu.vector_store %arg7[%c0_6, %c0_7], %11 {strides = array<i32>} : memref<8x32xf32, #tpu.memory_space<vmem>>, vector<8x32xf32>,
    %c0_i32_8 = arith.constant 0 : i32
    %13 = arith.cmpi eq, %arg2, %c0_i32_8 : i32
    %14 = arith.extui %13 : i1 to i32
    %c0_i32_9 = arith.constant 0 : i32
    %15 = arith.cmpi ne, %14, %c0_i32_9 : i32
    scf.if %15 {
      %c0_10 = arith.constant 0 : index
      %c0_11 = arith.constant 0 : index
      %16 = vector.load %arg7[%c0_10, %c0_11] : memref<8x32xf32, #tpu.memory_space<vmem>>, vector<8x32xf32>
      %c0_12 = arith.constant 0 : index
      %c0_13 = arith.constant 0 : index
      %c0_14 = arith.constant 0 : index
      %17 = vector.load %arg5[%c0_12, %c0_13, %c0_14] : memref<1x8x32xf32, #tpu.memory_space<vmem>>, vector<1x8x32xf32>
      %18 = vector.shape_cast %17 : vector<1x8x32xf32> to vector<8x32xf32>
      %19 = vector.shape_cast %16 : vector<8x32xf32> to vector<1x8x32xf32>
      tpu.vector_store %arg5[%c0_12, %c0_13, %c0_14], %19 {strides = array<i32>} : memref<1x8x32xf32, #tpu.memory_space<vmem>>, vector<1x8x32xf32>,
    } else {
    }
    return
  }
  func.func @transform_0(%arg0: i32, %arg1: i32, %arg2: i32) -> (i32, i32, i32) {
    %c0_i32 = arith.constant 0 : i32
    %c0_i32_0 = arith.constant 0 : i32
    %c0_i32_1 = arith.constant 0 : i32
    return %arg0, %c0_i32, %c0_i32_0 : i32, i32, i32
  }
  func.func @transform_1(%arg0: i32, %arg1: i32, %arg2: i32) -> (i32, i32, i32) {
    %c0_i32 = arith.constant 0 : i32
    return %arg0, %arg1, %arg2 : i32, i32, i32
  }
  func.func @transform_2(%arg0: i32, %arg1: i32, %arg2: i32) -> (i32, i32, i32) {
    %c0_i32 = arith.constant 0 : i32
    %c0_i32_0 = arith.constant 0 : i32
    return %arg0, %c0_i32, %arg1 : i32, i32, i32
  }
}

</mosaic_0001>

<bundles_post_ra>
// kernel: tpu_custom_call.1
= control target key start
LH: loop header
LB: loop body
LE: loop exit
PB: predicated region body
PF: predicated region fallthrough
CT: control target
= control target key end

     0   :  { %7 = vsyncpa [#allocation5], 0  ;;  %s978_s0 = inlined_call_operand.hbm [shape: f32[2,8,256], index: 0, kind: input, shape index: {}]   ;;  %s979_s1 = inlined_call_operand.hbm [shape: f32[2,32,256], index: 1, kind: input, shape index: {}]   ;;  %s980_s2 = inlined_call_operand.hbm [shape: f32[2,8,32], index: 2, kind: output, shape index: {}]  }
   0x1   :  { %9 = vsyncpa [#allocation5 + $0x1], 0 }
   0x2   :  { %10 = vsyncpa [#allocation8], 0 }
   0x3   :  { %12 = vsyncpa [#allocation8 + $0x1], 0 }
   0x4   :  { %13 = vsyncpa [#allocation6], 0 }
   0x5   :  { %15 = vsyncpa [#allocation6 + $0x1], 0  ;;  %s751_s9 = smov 0   ;;  %s753_s10 = smov 0  }
   0x6   :  { %s755_s11 = smov 0   ;;  %s757_s12 = smov 0  }
   0x7   :  { %s759_s13 = smov 0   ;;  %s761_s14 = smov 0  }
   0x8 LB: > { %s478_s15 = sadd.s32 4294967295, %s728_s14   ;;  %s479_s16 = sadd.s32 4294967294, %s728_s14   ;;  %s728_s14 = sphi %s761_s14, %s21_s14   ;;  %s724_s13 = sphi %s759_s13, %s999_s13   ;;  %s720_s12 = sphi %s757_s12, %s998_s12   ;;  %s716_s11 = sphi %s755_s11, %s997_s11   ;;  %s712_s10 = sphi %s753_s10, %s996_s10   ;;  %s708_s9 = sphi %s751_s9, %s995_s9  }
   0x9   : > { %s40_s17 = sadd.s32 1, %s724_s13  ;;  %s47_s18 = sadd.s32 1, %s716_s11 }
   0xa   : > { %p42_p0 = scmp.ge.s32.totalorder %s40_s17, 2  ;;  %p54_p1 = scmp.ne.s32.totalorder %s716_s11, %s712_s10 }
   0xb   : > { %p55_p2 = scmp.eq.s32.totalorder %s728_s14, 0  ;;  %p60_p3 = scmp.ne.s32.totalorder %s712_s10, %s708_s9 }
   0xc   : > { %s1001_s17 = smov (%p42_p0, %s40_s17), 0  ;;  %p61_p5 = scmp.eq.s32.totalorder %s478_s15, 0 }
   0xd   : > { %p792_p4 = por %p55_p2, %p54_p1  ;;  %s44_s20 = ssub.s32 %s724_s13, %s1001_s17 }
   0xe   : > { %p116_p6 = scmp.eq.s32.totalorder %s478_s15, 1  ;;  %p45_p7 = scmp.eq.s32.totalorder %s44_s20, 0 }
   0xf   : > { %p798_p8 = por %p61_p5, %p60_p3  ;;  %p122_p10 = scmp.eq.s32.totalorder %s479_s16, 1 }
  0x10   : > { %p802_p9 = por %p116_p6, %p54_p1  ;;  %p523_p13 = scmp.lt.s32.totalorder %s728_s14, 2 }
  0x11   : > { %s984_s21 = scalar_select %p798_p8, 1, 0 }
  0x12   : > { %s985_s22 = scalar_select %p802_p9, 1, 0 }
  0x13   : > { %s807_s23 = scalar_select %p45_p7, %s716_s11, %s47_s18  }
  0x14   : > { %p809_p11 = por %p122_p10, %p60_p3  ;;  %s816_s25 = sand.u32 1, %s716_s11  }
  0x15   : > { %s482_s26 = sshll.u32 %s816_s25, 4  ;;  %s496_s27 = sshll.u32 %s724_s13, 8 }
  0x16   : > { %s986_s24 = scalar_select %p809_p11, 1, 0 }
  0x17   : > { %s823_s30 = scalar_lea.hbm %s978_s0, %s496_s27  ;;  %s146_s3 = scalar_lea.vmem [#allocation4], %s482_s26 }
  0x18   : > { %s154_s4 = sshll.u32 %s146_s3, 4  ;;  %p829_p0 = pnand %p523_p13, %p792_p4  ;;  %s825_s4 = int_to_ptr.vmem [resolvable:$true] %s154_s4 }
  0x19   : > { %s143_s6 = scalar_lea.sflag [#allocation5], %s816_s25  ;;  %s582_s7 = scalar_lea.hbm %s823_s30, 256 }
  0x1a   : > { %p583_p3 = scmp.ne.s32.totalorder %s823_s30, %s582_s7  ;;  %p584_p5 = pneg %p829_p0 }
  0x1b   : > { %s587_s16 = scalar_lea.hbm %s978_s0, 512  ;;  %p588_p4 = scmp.lt.u32.totalorder %s823_s30, %s978_s0 }
  0x1c   : > { %p585_p6 = pnand %p584_p5, %p583_p3  ;;  %p589_p10 = scmp.lt.u32.totalorder %s587_s16, %s582_s7 }
  0x1d   : > { %p591_p12 = scmp.lt.u32.totalorder %s582_s7, %s823_s30 }
  0x1e   : > { %p586_p7 = pneg %p585_p6  ;;  %p590_p13 = por %p589_p10, %p588_p4 }
  0x20   : > { %p592_p1 = por %p591_p12, %p590_p13 }
  0x22   : > { %p593_p2 = pnand %p592_p1, %p586_p7 }
  0x24   : > { %596 = shalt.err (!%p593_p2)
}
  0x25   : > { %s597_s20 = scalar_lea.vmem %s825_s4, 256  ;;  %s730_s26 = smov [#allocation4]  }
  0x26   : > { %p598_p3 = scmp.ne.s32.totalorder %s825_s4, %s597_s20  ;;  %s602_s27 = sshll.u32 %s730_s26, 4  ;;  %s603_s27 = int_to_ptr.vmem [resolvable:$false] %s602_s27 }
  0x27   : > { %s604_s28 = scalar_lea.vmem %s603_s27, 512  ;;  %p605_p9 = scmp.lt.s32.totalorder %s825_s4, %s603_s27 }
  0x28   : > { %p600_p6 = pnand %p598_p3, %p584_p5  ;;  %p606_p4 = scmp.lt.s32.totalorder %s604_s28, %s597_s20 }
  0x2a   : > { %p601_p11 = pneg %p600_p6  ;;  %p607_p10 = por %p606_p4, %p605_p9 }
  0x2c   : > { %p608_p12 = pnand %p607_p10, %p601_p11 }
  0x2e   : > { %611 = shalt.err (!%p608_p12)
}
  0x2f   : > { %515 = dma.hbm_to_vmem [thread:$0]  (!%p829_p0), %s823_s30, 256, %s825_s4, %s143_s6  }
  0x30   : > { %p988_p1 = scmp.lt.s32.totalorder %s728_s14, 3  ;;  %p989_p2 = scmp.ge.s32.totalorder %s728_s14, 1 }
  0x31   : > { %s485_s3 = sshll.u32 %s816_s25, 6  ;;  %s497_s7 = sshll.u32 %s724_s13, 10 }
  0x32   : > { %p865_p7 = pnand %p989_p2, %p988_p1  ;;  %s874_s16 = scalar_lea.hbm %s979_s1, %s497_s7 }
  0x33   : > { %s165_s18 = scalar_lea.vmem [#allocation7], %s485_s3  ;;  %s162_s30 = scalar_lea.sflag [#allocation8], %s816_s25 }
  0x34   : > { %s177_s19 = sshll.u32 %s165_s18, 4  ;;  %s612_s4 = scalar_lea.hbm %s874_s16, 1024  ;;  %s876_s19 = int_to_ptr.vmem [resolvable:$true] %s177_s19 }
  0x35   : > { %p613_p9 = scmp.ne.s32.totalorder %s874_s16, %s612_s4  ;;  %s617_s26 = scalar_lea.hbm %s979_s1, 2048 }
  0x36   : > { %p618_p3 = scmp.lt.u32.totalorder %s874_s16, %s979_s1  ;;  %p619_p6 = scmp.lt.u32.totalorder %s617_s26, %s612_s4 }
  0x37   : > { %p615_p11 = pnand %p613_p9, %p584_p5  ;;  %p621_p10 = scmp.lt.u32.totalorder %s612_s4, %s874_s16 }
  0x38   : > { %p620_p4 = por %p619_p6, %p618_p3 }
  0x39   : > { %p616_p13 = pneg %p615_p11 }
  0x3a   : > { %p622_p12 = por %p621_p10, %p620_p4 }
  0x3c   : > { %p623_p1 = pnand %p622_p12, %p616_p13 }
  0x3e   : > { %626 = shalt.err (!%p623_p1)
}
  0x3f   : > { %s627_s3 = scalar_lea.vmem %s876_s19, 1024  ;;  %s731_s7 = smov [#allocation7]  }
  0x40   : > { %p628_p2 = scmp.ne.s32.totalorder %s876_s19, %s627_s3  ;;  %s632_s8 = sshll.u32 %s731_s7, 4  ;;  %s633_s8 = int_to_ptr.vmem [resolvable:$false] %s632_s8 }
  0x41   : > { %s634_s15 = scalar_lea.vmem %s633_s8, 2048  ;;  %p635_p8 = scmp.lt.s32.totalorder %s876_s19, %s633_s8 }
  0x42   : > { %p630_p9 = pnand %p628_p2, %p584_p5  ;;  %p636_p3 = scmp.lt.s32.totalorder %s634_s15, %s627_s3 }
  0x44   : > { %p631_p11 = pneg %p630_p9  ;;  %p637_p6 = por %p636_p3, %p635_p8 }
  0x46   : > { %p638_p4 = pnand %p637_p6, %p631_p11 }
  0x48   : > { %641 = shalt.err (!%p638_p4)
}
  0x49   : > { %s732_s18 = smov 256   ;;  %s733_s4 = smov 16  }
  0x4a   : > { %518 = dma.hbm_to_vmem [thread:$0]  (!%p829_p0), %s874_s16, 1024, %s876_s19, %s162_s30, %s732_s18, %s732_s18, %s733_s4  }
  0x4b   : > { %189 = sbr.rel (%p865_p7) target bundleno = 641 (0x281), region = 28  ;;  %s907_s6 = sand.u32 (!%p865_p7), 1, %s712_s10  }
  0x4c   : > { %s489_s20 = sshll.u32 (!%p865_p7), %s907_s6, 4  ;;  %s192_s26 = scalar_lea.sflag (!%p865_p7), [#allocation5], %s907_s6 }
  0x4d   : > { %s195_s27 = scalar_lea.vmem (!%p865_p7), [#allocation4], %s489_s20  ;;  %p991_p8 = scmp.ne.s32.totalorder (!%p865_p7), %s984_s21, 0 }
  0x52   : > { %695 = dma.done.wait (%p991_p8), %s192_s26, 256  }
  0x53   : > { %697 = vsyncadd (%p991_p8), %s192_s26, 4294967040  ;;  %s490_s25 = sshll.u32 %s907_s6, 6  ;;  %s201_s5 = scalar_lea.sflag [#allocation8], %s907_s6 }
  0x54   : > { %s204_s29 = scalar_lea.vmem [#allocation7], %s490_s25 }
  0x55   : > { %699 = dma.done.wait (%p991_p8), %s201_s5, 1024  }
  0x56   : > { %701 = vsyncadd (%p991_p8), %s201_s5, 4294966272  ;;  %v236_v0 = vld [vmem:[%s195_s27] sm:$0xff]  ;;  %v237_v1 = vld [vmem:[%s195_s27 + $0x8] sm:$0xff]  ;;  %vm255_vm0 = vcmask 261120   ;;  %v734_v23 = vmov 0.0   ;;  %s491_s21 = sshll.u32 %s907_s6, 3 }
  0x57   : > { %v238_v2 = vmax.f32 %v236_v0, %v237_v1  ;;  %v266_v3 = vld [vmem:[%s204_s29 + $0x8] sm:$0xff]  ;;  %v268_v4 = vld [vmem:[%s204_s29 + $0x18] sm:$0xff]  ;;  %v265_v5 = vld [vmem:[%s204_s29] sm:$0xff]  ;;  %256 = vst.msk [vmem:[#allocation3] sm:$0xff] %vm255_vm0, %v734_v23  ;;  %s493_s16 = sshll.u32 %s720_s12, 7  ;;  %s229_s19 = scalar_lea.vmem [#allocation9], %s491_s21 }
  0x58   : > { %v498_v6 = vpack.c.bf16 %v268_v4, %v266_v3  ;;  %v267_v7 = vld [vmem:[%s204_s29 + $0x10] sm:$0xff]  ;;  %v270_v17 = vld [vmem:[%s204_s29 + $0x28] sm:$0xff]  ;;  %v272_v18 = vld [vmem:[%s204_s29 + $0x38] sm:$0xff]  ;;  %s366_s30 = sshll.u32 %s229_s19, 4  ;;  %s928_s7 = scalar_lea.hbm %s980_s2, %s493_s16  ;;  %s930_s30 = int_to_ptr.vmem [resolvable:$true] %s366_s30 }
  0x59   : > { %239 = vmax.xlane.f32.xlu0 %v238_v2  ;;  %v500_v8 = vpack.c.bf16 %v267_v7, %v265_v5  ;;  %v269_v19 = vld [vmem:[%s204_s29 + $0x20] sm:$0xff]  ;;  %v502_v20 = vpack.c.bf16 %v272_v18, %v270_v17  ;;  %v271_v21 = vld [vmem:[%s204_s29 + $0x30] sm:$0xff]  ;;  %s352_s8 = scalar_lea.sflag [#allocation6], %s907_s6  ;;  %s642_s15 = scalar_lea.vmem %s930_s30, 128 }
  0x5a   : > { %499 = vmatprep.subr.bf16.mxu0 %v498_v6  ;;  %v504_v22 = vpack.c.bf16 %v271_v21, %v269_v19  ;;  %p643_p0 = scmp.ne.s32.totalorder %s930_s30, %s642_s15  ;;  %p992_p5 = scmp.ne.s32.totalorder %s985_s22, 0 }
  0x5b   : > { %501 = vmatpush1.bf16.xpose.msra.mxu0 %v500_v8  ;;  %s735_s12 = smov [#allocation9]  }
  0x5c   : > { %503 = vmatprep.subr.bf16.mxu0 %v502_v20  ;;  %p644_p7 = pnand %p643_p0, %p992_p5  ;;  %s646_s18 = sshll.u32 %s735_s12, 4  ;;  %s647_s18 = int_to_ptr.vmem [resolvable:$false] %s646_s18 }
  0x5d   : > { %s648_s4 = scalar_lea.vmem %s647_s18, 256  ;;  %p649_p10 = scmp.lt.s32.totalorder %s930_s30, %s647_s18 }
  0x5e   : > { %v264_v28 = vld [vmem:[#allocation3] sm:$0xff]  ;;  %p645_p13 = pneg %p644_p7  ;;  %p650_p12 = scmp.lt.s32.totalorder %s648_s4, %s642_s15 }
  0x60   : > { %p651_p1 = por %p650_p12, %p649_p10 }
  0x62   : > { %p652_p2 = pnand %p651_p1, %p645_p13 }
  0x63   : > { %505 = vmatpush1.bf16.xpose.msra.mxu0 %v504_v22 }
  0xe6   : > { %v240_v9 = vpop.xlane.xlu0 %239 }
  0xe7   : > { %v241_v10 = vsub.f32 %v236_v0, %v240_v9  ;;  %v242_v11 = vsub.f32 %v237_v1, %v240_v9 }
  0xe9   : > { %v243_v12 = vmul.f32 1.442695, %v241_v10  ;;  %v245_v13 = vmul.f32 1.442695, %v242_v11 }
  0xeb   : > { %576 = vpow2.f32 %v243_v12 }
  0xec   : > { %578 = vpow2.f32 %v245_v13 }
  0xf5   : > { %v577_v14 = vpop.eup %576 }
  0xf6   : > { %v579_v15 = vpop.eup %578 }
  0xf7   : > { %v247_v16 = vadd.f32 %v579_v15, %v577_v14 }
  0xf9   : > { %248 = vadd.xlane.f32.xlu0 %v247_v16 }
 0x186   : > { %v249_v24 = vpop.xlane.xlu0 %248 }
 0x187   : > { %580 = vrcp.f32 %v249_v24 }
 0x191   : > { %v581_v25 = vpop.eup %580 }
 0x192   : > { %v252_v26 = vmul.f32 %v581_v25, %v579_v15  ;;  %v251_v27 = vmul.f32 %v581_v25, %v577_v14 }
 0x194   : > { %337 = vmatprep.mubr.f32.mxu0 %v252_v26 }
 0x195   : > { %338 = vmatmul.mubr.f32.vlgmr.msra.gmra.mrb[0].mxu0 %v251_v27 }
 0x268   : > { %v339_v29 = vpop.f32.mrb[0].mxu0 }
 0x269   : > { %v343_v30 = vadd.f32 %v339_v29, %v264_v28  ;;  %v341_v31 = vpop.f32.mrb[1].mxu0 }
 0x26b   : > { %345 = vst.msk [vmem:[#allocation3] sm:$0xff] %vm255_vm0, %v343_v30 }
 0x272   : > { %v349_v32 = vld [vmem:[#allocation3] sm:$0xff] }
 0x273   : > { %350 = vst.msk [vmem:[%s229_s19] sm:$0xff] %vm255_vm0, %v349_v32 }
 0x274   : > { %655 = shalt.err (!%p652_p2)
}
 0x275   : > { %s656_s6 = scalar_lea.hbm %s928_s7, 128  ;;  %s660_s27 = scalar_lea.hbm %s980_s2, 256 }
 0x276   : > { %p657_p9 = scmp.ne.s32.totalorder %s928_s7, %s656_s6  ;;  %p661_p6 = scmp.lt.u32.totalorder %s928_s7, %s980_s2 }
 0x277   : > { %p662_p4 = scmp.lt.u32.totalorder %s660_s27, %s656_s6  ;;  %p664_p0 = scmp.lt.u32.totalorder %s656_s6, %s928_s7 }
 0x278   : > { %p658_p11 = pnand %p657_p9, %p992_p5 }
 0x279   : > { %p663_p8 = por %p662_p4, %p661_p6 }
 0x27a   : > { %p659_p3 = pneg %p658_p11 }
 0x27b   : > { %p665_p7 = por %p664_p0, %p663_p8 }
 0x27d   : > { %p666_p13 = pnand %p665_p7, %p659_p3 }
 0x27f   : > { %669 = shalt.err (!%p666_p13)
}
 0x280   : > { %510 = dma.vmem_to_hbm [thread:$0]  (%p992_p5), %s930_s30, 128, %s928_s7, %s352_s8  }
 0x281 PF: > { %s378_s29 = sand.u32 1, %s708_s9   ;;  %p993_p10 = scmp.ne.s32.totalorder %s986_s24, 0 }
 0x282   : > { %p994_p12 = scmp.ge.s32.totalorder %s728_s14, 2  ;;  %s379_s21 = scalar_lea.sflag [#allocation6], %s378_s29 }
 0x284   : > { %p520_p1 = pnand %p994_p12, %p993_p10 }
 0x286   : > { %703 = dma.done.wait (!%p520_p1), %s379_s21, 128  }
 0x287   : > { %705 = vsyncadd (!%p520_p1), %s379_s21, 4294967168  ;;  %s21_s14 = sadd.s32 1, %s728_s14   ;;  %s995_s9 = smov %s712_s10 }
 0x288   : > { %p18_p2 = scmp.ge.s32.totalorder %s21_s14, 4   ;;  %s996_s10 = smov %s716_s11 }
 0x289   : > { %s997_s11 = smov %s807_s23  ;;  %s998_s12 = smov %s724_s13 }
 0x28a   : > { %s999_s13 = smov %s1001_s17  ;;  %20 = sbr.rel (!%p18_p2) target bundleno = 8 (0x8), region = 95 }
 0x291   :  { %384 = vsyncpa [#allocation5], 1 }
 0x292   :  { %386 = vsyncpa [#allocation5 + $0x1], 1 }
 0x293   :  { %387 = vsyncpa [#allocation8], 1 }
 0x294   :  { %389 = vsyncpa [#allocation8 + $0x1], 1 }
 0x295   :  { %390 = vsyncpa [#allocation6], 1 }
 0x296   :  { %392 = vsyncpa [#allocation6 + $0x1], 1 }

</bundles_post_ra>
